<compile_context>
chip_gen: v5e
topology: v5e:2x2
jax: 0.10.0
libtpu: 0.0.40
codegen_flags: <defaults>
</compile_context>

<pallas_src>
import jax
import jax.numpy as jnp
import numpy as np
from jax import lax
from jax.experimental import pallas as pl
from jax.experimental.pallas import tpu as pltpu

# --- problem sizes (small, consistent with the module) ---
B = 4          # batch of timesteps (independent GAT forward calls)
N = 16         # number of nodes
E = 48         # number of edges
F_IN = 16      # num_in_features
H = 4          # num_of_heads
F_OUT = 8      # num_out_features (!= F_IN -> skip_proj branch of skip_concat_bias)
HF = H * F_OUT           # 32
BH = B * H               # 16   (lane-stacked per-head scores width)
BHF = B * HF             # 128  (lane-dense feature width = exactly one vreg lane span)
W_COLS = 2 * BHF + 2 * BH  # 288: proj | skip | s_src | s_trg (all batches, block-diag)

NEG_SLOPE = 0.2  # LeakyReLU slope


def gat_kernel(x_ref, ep_ref, w_ref, s_ref, t_ref, tt_ref, c_ref, out_ref):
    f32 = jnp.float32

    # One fused, batch-block-diagonal node-side matmul. Columns come out already
    # lane-stacked per batch: [proj | skip | s_src | s_trg].
    node = jnp.dot(x_ref[...], w_ref[...], preferred_element_type=f32)     # [N, W_COLS]
    proj  = node[:, :BHF]                                                  # [N, BHF]
    skip  = node[:, BHF:2 * BHF]                                           # [N, BHF]
    s_src = node[:, 2 * BHF:2 * BHF + BH]                                  # [N, BH]
    s_trg = node[:, 2 * BHF + BH:]                                         # [N, BH]

    S  = s_ref[...]                                                        # [E, N]
    T  = t_ref[...]                                                        # [E, N]
    Tt = tt_ref[...]                                                       # [N, E]

    # edge lift (gather) via incidence matmuls, all batches at once along lanes
    lift = (jnp.dot(S, s_src, preferred_element_type=f32)
            + jnp.dot(T, s_trg, preferred_element_type=f32))               # [E, BH]

    # trans-prob scoring collapsed to a tiny selector matmul (c_prob folded host-side)
    ep_sel = c_ref[BH + 1:, :BH]                                           # [B, BH]
    scores = lift + jnp.dot(ep_ref[...], ep_sel, preferred_element_type=f32)
    scores = jnp.where(scores > 0.0, scores, NEG_SLOPE * scores)           # LeakyReLU(0.2)
    scores = scores - jnp.max(scores)   # global max shift, as in the torch code
    exp_s = jnp.exp(scores)                                                # [E, BH]

    # neighborhood-aware softmax denominator: scatter_add over targets, gather back per edge
    denom_node = jnp.dot(Tt, exp_s, preferred_element_type=f32)            # [N, BH]
    denom_edge = jnp.dot(T, denom_node, preferred_element_type=f32)        # [E, BH]
    att = exp_s / (denom_edge + 1e-16)   # exact divide (approx reciprocal broke parity)

    # expand per-head attention across the F_OUT lanes of each head (precomputed selector)
    head_sel = c_ref[:BH, :]                                               # [BH, BHF]
    att_wide = jnp.dot(att, head_sel, preferred_element_type=f32)          # [E, BHF]

    # lift node features to edges, weight by attention, scatter_add to targets
    proj_lift = jnp.dot(S, proj, preferred_element_type=f32)               # [E, BHF]
    weighted = proj_lift * att_wide                                        # [E, BHF]
    out = jnp.dot(Tt, weighted, preferred_element_type=f32)                # [N, BHF]

    # skip_concat_bias: skip_proj branch (F_OUT != F_IN), concat heads, bias, ELU
    bias = c_ref[BH:BH + 1, :]                                             # [1, BHF]
    out = out + skip + bias
    # ELU(alpha=1); clamp exp argument so the discarded branch never produces inf
    out_ref[...] = jnp.where(out > 0.0, out, jnp.exp(jnp.minimum(out, 0.0)) - 1.0)


@jax.jit
def gat_forward(x_b, ep_b, w_big, s_mat, t_mat, tt_mat, consts):
    # layout plumbing only: stack batch along the lane axis
    x_ls = jnp.transpose(x_b, (1, 0, 2)).reshape(N, B * F_IN)              # [N, B*F_IN]
    ep_eb = jnp.transpose(ep_b[:, :, 0], (1, 0))                           # [E, B]

    vmem = pl.BlockSpec(memory_space=pltpu.MemorySpace.VMEM)
    out_ls = pl.pallas_call(
        gat_kernel,
        out_shape=jax.ShapeDtypeStruct((N, BHF), jnp.float32),             # lane-dense slab
        in_specs=[vmem] * 7,
        out_specs=vmem,
    )(x_ls, ep_eb, w_big, s_mat, t_mat, tt_mat, consts)

    return jnp.transpose(out_ls.reshape(N, B, HF), (1, 0, 2))              # [B, N, HF]


# ---------------- parameter setup (deterministic, glue JAX/numpy) ----------------
def xavier_uniform(key, shape, fan_in, fan_out):
    limit = float(np.sqrt(6.0 / (fan_in + fan_out)))
    return jax.random.uniform(key, shape, jnp.float32, -limit, limit)


def make_params(key):
    ks = jax.random.split(key, 6)
    w_proj = xavier_uniform(ks[0], (F_IN, HF), F_IN, HF)      # linear_proj.weight^T
    w_prob = xavier_uniform(ks[1], (1, HF), 1, HF)            # linear_proj_tran_prob.weight^T
    scoring_src = xavier_uniform(ks[2], (H, F_OUT), H * F_OUT, F_OUT)
    scoring_trg = xavier_uniform(ks[3], (H, F_OUT), H * F_OUT, F_OUT)
    scoring_prob = xavier_uniform(ks[4], (H, F_OUT), H * F_OUT, F_OUT)
    w_skip = xavier_uniform(ks[5], (F_IN, HF), F_IN, HF)      # skip_proj.weight^T
    bias = jnp.zeros((HF,), jnp.float32)
    return {
        "W_proj": w_proj, "W_prob": w_prob, "W_skip": w_skip, "bias": bias,
        "scoring_src": scoring_src, "scoring_trg": scoring_trg,
        "scoring_prob": scoring_prob,
    }


def pack_params(p):
    """Host-side algebraic folding + batch-block-diagonal packing into 2 kernel operands."""
    w_proj = np.asarray(p["W_proj"])
    w_skip = np.asarray(p["W_skip"])
    c_src = np.asarray((p["W_proj"].reshape(F_IN, H, F_OUT) * p["scoring_src"][None]).sum(-1))
    c_trg = np.asarray((p["W_proj"].reshape(F_IN, H, F_OUT) * p["scoring_trg"][None]).sum(-1))
    c_prob = np.asarray((p["W_prob"].reshape(H, F_OUT) * p["scoring_prob"]).sum(-1))  # [H]

    w_big = np.zeros((B * F_IN, W_COLS), np.float32)
    for b in range(B):
        r = slice(b * F_IN, (b + 1) * F_IN)
        w_big[r, b * HF:(b + 1) * HF] = w_proj
        w_big[r, BHF + b * HF:BHF + (b + 1) * HF] = w_skip
        w_big[r, 2 * BHF + b * H:2 * BHF + (b + 1) * H] = c_src
        w_big[r, 2 * BHF + BH + b * H:2 * BHF + BH + (b + 1) * H] = c_trg

    head_sel = np.zeros((BH, BHF), np.float32)        # att [E,BH] -> att_wide [E,BHF]
    for b in range(B):
        for h in range(H):
            head_sel[b * H + h, b * HF + h * F_OUT:b * HF + (h + 1) * F_OUT] = 1.0

    ep_sel = np.zeros((B, BH), np.float32)            # ep [E,B] -> ep*c_prob at col b*H+h
    for b in range(B):
        ep_sel[b, b * H:(b + 1) * H] = c_prob

    consts = np.zeros((BH + 1 + B, BHF), np.float32)
    consts[:BH, :] = head_sel                          # rows 0..BH-1 : head expansion selector
    consts[BH, :] = np.tile(np.asarray(p["bias"]), B)  # row  BH     : bias (lane-stacked)
    consts[BH + 1:, :BH] = ep_sel                      # rows BH+1.. : ep selector (c_prob folded)
    return jnp.asarray(w_big), jnp.asarray(consts)


def build_incidence(src, trg):
    """Batch-invariant one-hot incidence matrices, precomputed on the host."""
    src = np.asarray(src)
    trg = np.asarray(trg)
    s_mat = (np.arange(N)[None, :] == src[:, None]).astype(np.float32)   # [E, N]
    t_mat = (np.arange(N)[None, :] == trg[:, None]).astype(np.float32)   # [E, N]
    return jnp.asarray(s_mat), jnp.asarray(t_mat), jnp.asarray(t_mat.T)  # +T^T [N, E]


# ---------------- pure-JAX reference (mirrors torch semantics) ----------------
def reference(x, edge_prob, src, trg, p):
    hp = lax.Precision.HIGHEST
    proj = jnp.dot(x, p["W_proj"], precision=hp).reshape(N, H, F_OUT)
    s_src = (proj * p["scoring_src"][None]).sum(-1)                  # [N, H]
    s_trg = (proj * p["scoring_trg"][None]).sum(-1)                  # [N, H]
    tp = (edge_prob * p["W_prob"]).reshape(E, H, F_OUT)
    s_tp = (tp * p["scoring_prob"][None]).sum(-1)                    # [E, H]
    scores = s_src[src] + s_trg[trg] + s_tp
    scores = jnp.where(scores > 0.0, scores, NEG_SLOPE * scores)
    scores = scores - scores.max()
    exp_s = jnp.exp(scores)
    denom = jax.ops.segment_sum(exp_s, trg, num_segments=N)
    att = exp_s / (denom[trg] + 1e-16)
    weighted = proj[src] * att[:, :, None]
    out = jax.ops.segment_sum(weighted, trg, num_segments=N)         # [N, H, F_OUT]
    skip = jnp.dot(x, p["W_skip"], precision=hp).reshape(N, H, F_OUT)
    out = (out + skip).reshape(N, HF) + p["bias"]
    return jnp.where(out > 0.0, out, jnp.exp(out) - 1.0)


if __name__ == "__main__":
    key = jax.random.PRNGKey(0)
    kx, ks_, kt, kp, kw = jax.random.split(key, 5)

    x = jax.random.normal(kx, (B, N, F_IN), jnp.float32)
    src = jax.random.randint(ks_, (E,), 0, N, jnp.int32)      # edge_index[0]
    trg = jax.random.randint(kt, (E,), 0, N, jnp.int32)       # edge_index[1]
    edge_prob = jax.random.uniform(kp, (B, E, 1), jnp.float32)

    params = make_params(kw)
    w_big, consts = pack_params(params)
    s_mat, t_mat, tt_mat = build_incidence(src, trg)

    out = gat_forward(x, edge_prob, w_big, s_mat, t_mat, tt_mat, consts)
    out = jax.block_until_ready(out)

    ref = jax.vmap(lambda xb, epb: reference(xb, epb, src, trg, params))(x, edge_prob)
    np.testing.assert_allclose(np.asarray(out), np.asarray(ref), rtol=1e-3, atol=1e-3)

    print("KERNEL_OK")
</pallas_src>

<mosaic_0001>
module attributes {stable_mosaic.version = 11 : i64} {
  func.func @gat_kernel(%arg0: memref<16x64xf32, #tpu.memory_space<vmem>>, %arg1: memref<48x4xf32, #tpu.memory_space<vmem>>, %arg2: memref<64x288xf32, #tpu.memory_space<vmem>>, %arg3: memref<48x16xf32, #tpu.memory_space<vmem>>, %arg4: memref<48x16xf32, #tpu.memory_space<vmem>>, %arg5: memref<16x48xf32, #tpu.memory_space<vmem>>, %arg6: memref<21x128xf32, #tpu.memory_space<vmem>>, %arg7: memref<16x128xf32, #tpu.memory_space<vmem>>) attributes {dimension_semantics = [], scalar_prefetch = 0 : i64, scratch_operands = 0 : i64, tpu.core_type = #tpu.core_type<tc>} {
    %c0 = arith.constant 0 : index
    %c0_0 = arith.constant 0 : index
    %0 = vector.load %arg0[%c0, %c0_0] : memref<16x64xf32, #tpu.memory_space<vmem>>, vector<16x64xf32>
    %c0_1 = arith.constant 0 : index
    %c0_2 = arith.constant 0 : index
    %1 = vector.load %arg2[%c0_1, %c0_2] : memref<64x288xf32, #tpu.memory_space<vmem>>, vector<64x288xf32>
    %cst = arith.constant dense<0.000000e+00> : vector<16x288xf32>
    %2 = tpu.matmul %0, %1, %cst {dimension_numbers = #tpu.dot_dimension_numbers<[1], [0], [0], [1], [0, 0, 1, 1], [], []>} : vector<16x64xf32>, vector<64x288xf32>, vector<16x288xf32> -> vector<16x288xf32>
    %3 = vector.extract_strided_slice %2 {offsets = [0, 0], sizes = [16, 128], strides = [1, 1]} : vector<16x288xf32> to vector<16x128xf32>
    %4 = vector.extract_strided_slice %2 {offsets = [0, 128], sizes = [16, 128], strides = [1, 1]} : vector<16x288xf32> to vector<16x128xf32>
    %5 = vector.extract_strided_slice %2 {offsets = [0, 256], sizes = [16, 16], strides = [1, 1]} : vector<16x288xf32> to vector<16x16xf32>
    %6 = vector.extract_strided_slice %2 {offsets = [0, 272], sizes = [16, 16], strides = [1, 1]} : vector<16x288xf32> to vector<16x16xf32>
    %c0_3 = arith.constant 0 : index
    %c0_4 = arith.constant 0 : index
    %7 = vector.load %arg3[%c0_3, %c0_4] : memref<48x16xf32, #tpu.memory_space<vmem>>, vector<48x16xf32>
    %c0_5 = arith.constant 0 : index
    %c0_6 = arith.constant 0 : index
    %8 = vector.load %arg4[%c0_5, %c0_6] : memref<48x16xf32, #tpu.memory_space<vmem>>, vector<48x16xf32>
    %c0_7 = arith.constant 0 : index
    %c0_8 = arith.constant 0 : index
    %9 = vector.load %arg5[%c0_7, %c0_8] : memref<16x48xf32, #tpu.memory_space<vmem>>, vector<16x48xf32>
    %cst_9 = arith.constant dense<0.000000e+00> : vector<48x16xf32>
    %10 = tpu.matmul %7, %5, %cst_9 {dimension_numbers = #tpu.dot_dimension_numbers<[1], [0], [0], [1], [0, 0, 1, 1], [], []>} : vector<48x16xf32>, vector<16x16xf32>, vector<48x16xf32> -> vector<48x16xf32>
    %cst_10 = arith.constant dense<0.000000e+00> : vector<48x16xf32>
    %11 = tpu.matmul %8, %6, %cst_10 {dimension_numbers = #tpu.dot_dimension_numbers<[1], [0], [0], [1], [0, 0, 1, 1], [], []>} : vector<48x16xf32>, vector<16x16xf32>, vector<48x16xf32> -> vector<48x16xf32>
    %12 = arith.addf %10, %11 : vector<48x16xf32>
    %c17 = arith.constant 17 : index
    %c0_11 = arith.constant 0 : index
    %13 = vector.load %arg6[%c17, %c0_11] : memref<21x128xf32, #tpu.memory_space<vmem>>, vector<4x16xf32>
    %c0_12 = arith.constant 0 : index
    %c0_13 = arith.constant 0 : index
    %14 = vector.load %arg1[%c0_12, %c0_13] : memref<48x4xf32, #tpu.memory_space<vmem>>, vector<48x4xf32>
    %cst_14 = arith.constant dense<0.000000e+00> : vector<48x16xf32>
    %15 = tpu.matmul %14, %13, %cst_14 {dimension_numbers = #tpu.dot_dimension_numbers<[1], [0], [0], [1], [0, 0, 1, 1], [], []>} : vector<48x4xf32>, vector<4x16xf32>, vector<48x16xf32> -> vector<48x16xf32>
    %16 = arith.addf %12, %15 : vector<48x16xf32>
    %cst_15 = arith.constant 0.000000e+00 : f32
    %17 = vector.broadcast %cst_15 : f32 to vector<48x16xf32>
    %18 = arith.cmpf ogt, %16, %17 : vector<48x16xf32>
    %cst_16 = arith.constant 2.000000e-01 : f32
    %19 = vector.broadcast %cst_16 : f32 to vector<48x16xf32>
    %20 = arith.mulf %19, %16 : vector<48x16xf32>
    %21 = arith.select %18, %16, %20 : vector<48x16xi1>, vector<48x16xf32>
    %22 = vector.shape_cast %21 : vector<48x16xf32> to vector<1x48x16xf32>
    %cst_17 = arith.constant dense<0xFF800000> : vector<1xf32>
    %23 = vector.multi_reduction <maximumf>, %22, %cst_17 [1, 2] : vector<1x48x16xf32> to vector<1xf32>
    %24 = vector.shape_cast %23 : vector<1xf32> to vector<1x1x1xf32>
    %25 = vector.extract %24[0, 0, 0] : f32 from vector<1x1x1xf32>
    %26 = vector.broadcast %25 : f32 to vector<48x16xf32>
    %27 = arith.subf %21, %26 : vector<48x16xf32>
    %28 = math.exp %27 : vector<48x16xf32>
    %cst_18 = arith.constant dense<0.000000e+00> : vector<16x16xf32>
    %29 = tpu.matmul %9, %28, %cst_18 {dimension_numbers = #tpu.dot_dimension_numbers<[1], [0], [0], [1], [0, 0, 1, 1], [], []>} : vector<16x48xf32>, vector<48x16xf32>, vector<16x16xf32> -> vector<16x16xf32>
    %cst_19 = arith.constant dense<0.000000e+00> : vector<48x16xf32>
    %30 = tpu.matmul %8, %29, %cst_19 {dimension_numbers = #tpu.dot_dimension_numbers<[1], [0], [0], [1], [0, 0, 1, 1], [], []>} : vector<48x16xf32>, vector<16x16xf32>, vector<48x16xf32> -> vector<48x16xf32>
    %cst_20 = arith.constant 1.000000e-16 : f32
    %31 = vector.broadcast %cst_20 : f32 to vector<48x16xf32>
    %32 = arith.addf %30, %31 : vector<48x16xf32>
    %33 = arith.divf %28, %32 : vector<48x16xf32>
    %c0_21 = arith.constant 0 : index
    %c0_22 = arith.constant 0 : index
    %34 = vector.load %arg6[%c0_21, %c0_22] : memref<21x128xf32, #tpu.memory_space<vmem>>, vector<16x128xf32>
    %cst_23 = arith.constant dense<0.000000e+00> : vector<48x128xf32>
    %35 = tpu.matmul %33, %34, %cst_23 {dimension_numbers = #tpu.dot_dimension_numbers<[1], [0], [0], [1], [0, 0, 1, 1], [], []>} : vector<48x16xf32>, vector<16x128xf32>, vector<48x128xf32> -> vector<48x128xf32>
    %cst_24 = arith.constant dense<0.000000e+00> : vector<48x128xf32>
    %36 = tpu.matmul %7, %3, %cst_24 {dimension_numbers = #tpu.dot_dimension_numbers<[1], [0], [0], [1], [0, 0, 1, 1], [], []>} : vector<48x16xf32>, vector<16x128xf32>, vector<48x128xf32> -> vector<48x128xf32>
    %37 = arith.mulf %36, %35 : vector<48x128xf32>
    %cst_25 = arith.constant dense<0.000000e+00> : vector<16x128xf32>
    %38 = tpu.matmul %9, %37, %cst_25 {dimension_numbers = #tpu.dot_dimension_numbers<[1], [0], [0], [1], [0, 0, 1, 1], [], []>} : vector<16x48xf32>, vector<48x128xf32>, vector<16x128xf32> -> vector<16x128xf32>
    %c16 = arith.constant 16 : index
    %c0_26 = arith.constant 0 : index
    %39 = vector.load %arg6[%c16, %c0_26] : memref<21x128xf32, #tpu.memory_space<vmem>>, vector<1x128xf32>
    %40 = arith.addf %38, %4 : vector<16x128xf32>
    %41 = vector.broadcast %39 : vector<1x128xf32> to vector<16x128xf32>
    %42 = arith.addf %40, %41 : vector<16x128xf32>
    %cst_27 = arith.constant 0.000000e+00 : f32
    %43 = vector.broadcast %cst_27 : f32 to vector<16x128xf32>
    %44 = arith.cmpf ogt, %42, %43 : vector<16x128xf32>
    %cst_28 = arith.constant 0.000000e+00 : f32
    %45 = vector.broadcast %cst_28 : f32 to vector<16x128xf32>
    %46 = arith.minimumf %42, %45 : vector<16x128xf32>
    %47 = math.exp %46 : vector<16x128xf32>
    %cst_29 = arith.constant 1.000000e+00 : f32
    %48 = vector.broadcast %cst_29 : f32 to vector<16x128xf32>
    %49 = arith.subf %47, %48 : vector<16x128xf32>
    %50 = arith.select %44, %42, %49 : vector<16x128xi1>, vector<16x128xf32>
    %c0_30 = arith.constant 0 : index
    %c0_31 = arith.constant 0 : index
    %51 = vector.load %arg7[%c0_30, %c0_31] : memref<16x128xf32, #tpu.memory_space<vmem>>, vector<16x128xf32>
    tpu.vector_store %arg7[%c0_30, %c0_31], %50 {strides = array<i32>} : memref<16x128xf32, #tpu.memory_space<vmem>>, vector<16x128xf32>,
    return
  }
}

</mosaic_0001>

<bundles_post_ra>
// kernel: gat_forward.1
= control target key start
LH: loop header
LB: loop body
LE: loop exit
PB: predicated region body
PF: predicated region fallthrough
CT: control target
= control target key end

     0   :  { %vm52_vm0 = vcmask 523264   ;;  %vm150_vm1 = vcmask 130048   ;;  %vm283_vm2 = vcmask 1043456   ;;  %vm264_vm3 = vcmask 31744   ;;  %s1080_s2 = inlined_call_operand.vmem [shape: f32[64,288], index: 2, kind: input, shape index: {}]   ;;  %s1081_s0 = inlined_call_operand.vmem [shape: f32[16,64], index: 0, kind: input, shape index: {}]   ;;  %s1082_s6 = inlined_call_operand.vmem [shape: f32[21,128], index: 6, kind: input, shape index: {}]   ;;  %s1083_s3 = inlined_call_operand.vmem [shape: f32[48,16], index: 3, kind: input, shape index: {}]   ;;  %s1084_s1 = inlined_call_operand.vmem [shape: f32[48,4], index: 1, kind: input, shape index: {}]   ;;  %s1085_s4 = inlined_call_operand.vmem [shape: f32[48,16], index: 4, kind: input, shape index: {}]   ;;  %s1086_s5 = inlined_call_operand.vmem [shape: f32[16,48], index: 5, kind: input, shape index: {}]   ;;  %s1087_s7 = inlined_call_operand.vmem [shape: f32[16,128], index: 7, kind: output, shape index: {}]  }
   0x1   :  { %v51_v0 = vld [vmem:[%s1080_s2 + $0xb8] sm:$0xff]  ;;  %v48_v1 = vld [vmem:[%s1080_s2 + $0xa0] sm:$0xff]  ;;  %v45_v2 = vld [vmem:[%s1080_s2 + $0x88] sm:$0xff]  ;;  %vm385_vm10 = vcmask 392192  }
   0x2   :  { %113 = vmatpush.msra.mxu2 %v51_v0  ;;  %v42_v3 = vld [vmem:[%s1080_s2 + $0x70] sm:$0xff]  ;;  %v39_v4 = vld [vmem:[%s1080_s2 + $0x58] sm:$0xff]  ;;  %v36_v5 = vld [vmem:[%s1080_s2 + $0x40] sm:$0xff] }
   0x3   :  { %v33_v6 = vld [vmem:[%s1080_s2 + $0x28] sm:$0xff]  ;;  %v30_v7 = vld [vmem:[%s1080_s2 + $0x10] sm:$0xff]  ;;  %v26_v8 = vld [vmem:[%s1081_s0] sm:$0xff] }
   0x4   :  { %114 = vmatpush.msra.mxu2 %v48_v1  ;;  %v27_v9 = vld [vmem:[%s1081_s0 + $0x8] sm:$0xff]  ;;  %v46_v11 = vld [vmem:[%s1080_s2 + $0x90] sm:$0xff]  ;;  %v43_v12 = vld [vmem:[%s1080_s2 + $0x78] sm:$0xff]  ;;  %s773_s0 = smov 112  }
   0x5   :  { %v49_v10 = vld [vmem:[%s1080_s2 + $0xa8] sm:$0xff]  ;;  %v40_v13 = vld [vmem:[%s1080_s2 + $0x60] sm:$0xff]  ;;  %v34_v15 = vld [vmem:[%s1080_s2 + $0x30] sm:$0xff] }
   0x6   :  { %115 = vmatpush.msra.mxu2 %v45_v2  ;;  %67 = vmatpush.msra.mxu1 %v49_v10  ;;  %v37_v14 = vld [vmem:[%s1080_s2 + $0x48] sm:$0xff]  ;;  %v31_v16 = vld [vmem:[%s1080_s2 + $0x18] sm:$0xff]  ;;  %v28_v17 = vld [vmem:[%s1080_s2] sm:$0xff] }
   0x7   :  { %v50_v18 = vld [vmem:[%s1080_s2 + $0xb0] sm:$0xff]  ;;  %v47_v19 = vld [vmem:[%s1080_s2 + $0x98] sm:$0xff]  ;;  %v44_v20 = vld [vmem:[%s1080_s2 + $0x80] sm:$0xff] }
   0x8   :  { %116 = vmatpush.msra.mxu2 %v42_v3  ;;  %68 = vmatpush.msra.mxu1 %v46_v11  ;;  %v41_v21 = vld [vmem:[%s1080_s2 + $0x68] sm:$0xff]  ;;  %v38_v23 = vld [vmem:[%s1080_s2 + $0x50] sm:$0xff]  ;;  %v35_v24 = vld [vmem:[%s1080_s2 + $0x38] sm:$0xff] }
   0x9   :  { %v32_v25 = vld [vmem:[%s1080_s2 + $0x20] sm:$0xff]  ;;  %v29_v26 = vld [vmem:[%s1080_s2 + $0x8] sm:$0xff]  ;;  %v257_v30 = vld [vmem:[%s1082_s6 + $0x11] sm:$0xf] }
   0xa   :  { %117 = vmatpush.msra.mxu2 %v39_v4  ;;  %69 = vmatpush.msra.mxu1 %v43_v12  ;;  %v128_v29 = vld [vmem:[%s1083_s3] sm:$0xff]  ;;  %v129_v32 = vld [vmem:[%s1083_s3 + $0x8] sm:$0xff]  ;;  %v130_v34 = vld [vmem:[%s1083_s3 + $0x10] sm:$0xff] }
   0xb   :  { %v258_v31 = vld [vmem:[%s1084_s1] sm:$0xff]  ;;  %v259_v33 = vld [vmem:[%s1084_s1 + $0x8] sm:$0xff]  ;;  %v260_v35 = vld [vmem:[%s1084_s1 + $0x10] sm:$0xff] }
   0xc   :  { %118 = vmatpush.msra.mxu2 %v36_v5  ;;  %70 = vmatpush.msra.mxu1 %v40_v13  ;;  %v131_v36 = vld [vmem:[%s1083_s3 + $0x18] sm:$0xff]  ;;  %v932_v40 = vld [vmem:[%s1085_s4] sm:$0xff]  ;;  %v947_v43 = vld [vmem:[%s1085_s4 + $0x8] sm:$0xff] }
   0xd   :  { %v261_v41 = vld [vmem:[%s1084_s1 + $0x18] sm:$0xff]  ;;  %v132_v42 = vld [vmem:[%s1083_s3 + $0x20] sm:$0xff]  ;;  %v133_v45 = vld [vmem:[%s1083_s3 + $0x28] sm:$0xff] }
   0xe   :  { %119 = vmatpush.msra.mxu2 %v33_v6  ;;  %71 = vmatpush.msra.mxu1 %v37_v14  ;;  %v262_v44 = vld [vmem:[%s1084_s1 + $0x20] sm:$0xff]  ;;  %v962_v47 = vld [vmem:[%s1085_s4 + $0x10] sm:$0xff]  ;;  %v263_v48 = vld [vmem:[%s1084_s1 + $0x28] sm:$0xff] }
   0xf   :  { %v974_v50 = vld [vmem:[%s1085_s4 + $0x18] sm:$0xff]  ;;  %v982_v51 = vld [vmem:[%s1085_s4 + $0x20] sm:$0xff]  ;;  %v990_v52 = vld [vmem:[%s1085_s4 + $0x28] sm:$0xff] }
  0x10   :  { %120 = vmatpush.msra.mxu2 %v30_v7  ;;  %72 = vmatpush.msra.mxu1 %v34_v15 }
  0x11   :  { %685 = vmatmul.msk.f32.vlgmr.msra.gmra.mxu2 %vm52_vm0, %v26_v8 }
  0x12   :  { %73 = vmatpush.msra.mxu1 %v31_v16 }
  0x14   :  { %74 = vmatpush.msra.mxu1 %v28_v17 }
  0x15   :  { %681 = vmatmul.msk.f32.vlgmr.msra.gmra.mxu1 %vm52_vm0, %v26_v8 }
  0x16   :  { %90 = vmatpush.msrb.mxu1 %v50_v18 }
  0x18   :  { %91 = vmatpush.msrb.mxu1 %v47_v19 }
  0x19   :  { %686 = vmatmul.msk.f32.gmra.mxu2 %vm52_vm0, %v27_v9 }
  0x1a   :  { %92 = vmatpush.msrb.mxu1 %v44_v20 }
  0x1c   :  { %93 = vmatpush.msrb.mxu1 %v41_v21 }
  0x1d   :  { %682 = vmatmul.msk.f32.gmra.mxu1 %vm52_vm0, %v27_v9 }
  0x1e   :  { %94 = vmatpush.msrb.mxu1 %v38_v23 }
  0x20   :  { %95 = vmatpush.msrb.mxu1 %v35_v24 }
  0x22   :  { %96 = vmatpush.msrb.mxu1 %v32_v25 }
  0x24   :  { %97 = vmatpush.msrb.mxu1 %v29_v26 }
  0x25   :  { %683 = vmatmul.msk.f32.vlgmr.msrb.gmra.mxu1 %vm52_vm0, %v26_v8 }
  0x26   :  { %699 = vmatpush.msk.msra.mxu1 %vm283_vm2, %v257_v30 }
  0x2d   :  { %684 = vmatmul.msk.f32.gmra.mxu1 %vm52_vm0, %v27_v9 }
  0x35   :  { %700 = vmatmul.msk.f32.vlgmr.msra.gmra.mxu1 %vm264_vm3, %v258_v31 }
  0x3d   :  { %701 = vmatmul.msk.f32.gmra.mxu1 %vm264_vm3, %v259_v33 }
  0x45   :  { %702 = vmatmul.msk.f32.gmra.mxu1 %vm264_vm3, %v260_v35 }
  0x4d   :  { %703 = vmatmul.msk.f32.gmra.mxu1 %vm264_vm3, %v261_v41 }
  0x55   :  { %704 = vmatmul.msk.f32.gmra.mxu1 %vm264_vm3, %v262_v44 }
  0x5d   :  { %705 = vmatmul.msk.f32.gmra.mxu1 %vm264_vm3, %v263_v48 }
  0x92   :  { %v76_v46 = vpop.f32.mrf.mxu1 }
  0x94   :  { %v122_v22 = vpop.f32.mrf.mxu2 }
  0x9a   :  { %v79_v49 = vpop.f32.mrf.mxu1 }
  0x9c   :  { %v125_v27 = vpop.f32.mrf.mxu2 }
  0x9d   :  { %236 = vmatpush.msra.mxu0 %v125_v27  ;;  %v739_v28 = vpack.i.bf16 %v122_v22, %v125_v27 }
  0x9f   :  { %740 = vrot.lane.b32.xlu0 %v739_v28, %s773_s0  ;;  %237 = vmatpush.msra.mxu0 %v122_v22 }
  0xa0   :  { %693 = vmatmul.msk.f32.vlgmr.msra.gmra.mxu0 %vm150_vm1, %v128_v29 }
  0xa1   :  { %609 = vmatpush.msrb.mxu0 %v79_v49 }
  0xa2   :  { %v997_v53 = vpop.f32.mrf.mxu1 }
  0xa3   :  { %610 = vmatpush.msrb.mxu0 %v76_v46 }
  0xa8   :  { %694 = vmatmul.msk.f32.gmra.mxu0 %vm150_vm1, %v129_v32 }
  0xaa   :  { %v999_v54 = vpop.f32.mrf.mxu1 }
  0xb0   :  { %695 = vmatmul.msk.f32.gmra.mxu0 %vm150_vm1, %v130_v34 }
  0xb2   :  { %v304_v56 = vpop.f32.mrf.mxu1 }
  0xb8   :  { %696 = vmatmul.msk.f32.gmra.mxu0 %vm150_vm1, %v131_v36 }
  0xba   :  { %v307_v59 = vpop.f32.mrf.mxu1 }
  0xc0   :  { %697 = vmatmul.msk.f32.gmra.mxu0 %vm150_vm1, %v132_v42 }
  0xc2   :  { %v310_v62 = vpop.f32.mrf.mxu1 }
  0xc8   :  { %698 = vmatmul.msk.f32.gmra.mxu0 %vm150_vm1, %v133_v45 }
  0xca   :  { %v313_v1 = vpop.f32.mrf.mxu1 }
  0xd0   :  { %720 = vmatmul.msk.f32.vlgmr.msrb.gmra.mxu0 %vm150_vm1, %v128_v29 }
  0xd2   :  { %v316_v4 = vpop.f32.mrf.mxu1 }
  0xd8   :  { %721 = vmatmul.msk.f32.gmra.mxu0 %vm150_vm1, %v129_v32 }
  0xda   :  { %v319_v20 = vpop.f32.mrf.mxu1 }
  0xe0   :  { %722 = vmatmul.msk.f32.gmra.mxu0 %vm150_vm1, %v130_v34 }
  0xe8   :  { %723 = vmatmul.msk.f32.gmra.mxu0 %vm150_vm1, %v131_v36 }
  0xf0   :  { %724 = vmatmul.msk.f32.gmra.mxu0 %vm150_vm1, %v132_v42 }
  0xf8   :  { %725 = vmatmul.msk.f32.gmra.mxu0 %vm150_vm1, %v133_v45 }
 0x111   :  { %v741_v37 = vpop.permute.xlu0 %740 }
 0x112   :  { %v742_v38 = vunpack.i.l.bf16 %v741_v37  ;;  %v743_v39 = vunpack.i.h.bf16 %v741_v37 }
 0x114   :  { %183 = vmatpush.msra.mxu3 %v742_v38 }
 0x116   :  { %184 = vmatpush.msra.mxu3 %v743_v39 }
 0x117   :  { %687 = vmatmul.msk.f32.vlgmr.msra.gmra.mxu3 %vm150_vm1, %v932_v40 }
 0x11d   :  { %v239_v55 = vpop.f32.mrf.mxu0 }
 0x11f   :  { %688 = vmatmul.msk.f32.gmra.mxu3 %vm150_vm1, %v947_v43 }
 0x125   :  { %v242_v57 = vpop.f32.mrf.mxu0 }
 0x127   :  { %689 = vmatmul.msk.f32.gmra.mxu3 %vm150_vm1, %v962_v47 }
 0x12d   :  { %v245_v61 = vpop.f32.mrf.mxu0 }
 0x12f   :  { %690 = vmatmul.msk.f32.gmra.mxu3 %vm150_vm1, %v974_v50 }
 0x135   :  { %v248_v0 = vpop.f32.mrf.mxu0 }
 0x137   :  { %691 = vmatmul.msk.f32.gmra.mxu3 %vm150_vm1, %v982_v51 }
 0x13d   :  { %v251_v3 = vpop.f32.mrf.mxu0 }
 0x13f   :  { %692 = vmatmul.msk.f32.gmra.mxu3 %vm150_vm1, %v990_v52 }
 0x145   :  { %v254_v15 = vpop.f32.mrf.mxu0 }
 0x19a   :  { %v186_v58 = vpop.f32.mrf.mxu3 }
 0x19b   :  { %v240_v5 = vadd.f32 %v239_v55, %v186_v58 }
 0x19d   :  { %v322_v12 = vadd.f32 %v304_v56, %v240_v5 }
 0x19f   :  { %v334_v18 = vmul.f32 0.2, %v322_v12  ;;  %vm328_vm5 = vcmp.gt.f32.partialorder %v322_v12, 0.0 }
 0x1a1   :  { %v340_v27 = vsel %vm328_vm5, %v322_v12, %v334_v18  ;;  %v541_v18 = vld [vmem:[%s1082_s6 + $0x8] sm:$0xff] }
 0x1a2   :  { %v189_v60 = vpop.f32.mrf.mxu3  ;;  %v346_v34 = vsel %vm150_vm1, %v340_v27, -inf  ;;  %574 = vmatpush.msrb.mxu3 %v541_v18 }
 0x1a3   :  { %v243_v7 = vadd.f32 %v242_v57, %v189_v60 }
 0x1a5   :  { %v323_v13 = vadd.f32 %v307_v59, %v243_v7 }
 0x1a7   :  { %v335_v21 = vmul.f32 0.2, %v323_v13  ;;  %vm329_vm6 = vcmp.gt.f32.partialorder %v323_v13, 0.0 }
 0x1a9   :  { %v341_v28 = vsel %vm329_vm6, %v323_v13, %v335_v21  ;;  %v1025_v13 = vld [vmem:[%s1086_s5] sm:$0xff] }
 0x1aa   :  { %v192_v63 = vpop.f32.mrf.mxu3  ;;  %v347_v35 = vsel %vm150_vm1, %v341_v28, -inf }
 0x1ab   :  { %v246_v10 = vadd.f32 %v245_v61, %v192_v63 }
 0x1ad   :  { %v324_v16 = vadd.f32 %v310_v62, %v246_v10 }
 0x1af   :  { %v336_v24 = vmul.f32 0.2, %v324_v16  ;;  %vm330_vm8 = vcmp.gt.f32.partialorder %v324_v16, 0.0 }
 0x1b1   :  { %v342_v32 = vsel %vm330_vm8, %v324_v16, %v336_v24 }
 0x1b2   :  { %v195_v2 = vpop.f32.mrf.mxu3  ;;  %v348_v41 = vsel %vm150_vm1, %v342_v32, -inf }
 0x1b3   :  { %v249_v8 = vadd.f32 %v248_v0, %v195_v2 }
 0x1b5   :  { %v325_v14 = vadd.f32 %v313_v1, %v249_v8 }
 0x1b7   :  { %v337_v22 = vmul.f32 0.2, %v325_v14  ;;  %vm331_vm7 = vcmp.gt.f32.partialorder %v325_v14, 0.0 }
 0x1b9   :  { %v343_v29 = vsel %vm331_vm7, %v325_v14, %v337_v22 }
 0x1ba   :  { %v198_v6 = vpop.f32.mrf.mxu3  ;;  %v349_v37 = vsel %vm150_vm1, %v343_v29, -inf }
 0x1bb   :  { %v252_v9 = vadd.f32 %v251_v3, %v198_v6  ;;  %v355_v44 = vmax.f32 %v348_v41, %v349_v37 }
 0x1bd   :  { %v326_v11 = vadd.f32 %v316_v4, %v252_v9 }
 0x1bf   :  { %v338_v17 = vmul.f32 0.2, %v326_v11  ;;  %vm332_vm4 = vcmp.gt.f32.partialorder %v326_v11, 0.0 }
 0x1c1   :  { %v344_v25 = vsel %vm332_vm4, %v326_v11, %v338_v17 }
 0x1c2   :  { %v201_v19 = vpop.f32.mrf.mxu3  ;;  %v350_v31 = vsel %vm150_vm1, %v344_v25, -inf }
 0x1c3   :  { %v255_v23 = vadd.f32 %v254_v15, %v201_v19  ;;  %v351_v38 = vmax.f32 %v346_v34, %v350_v31  ;;  %v1032_v15 = vld [vmem:[%s1086_s5 + $0x8] sm:$0xff] }
 0x1c5   :  { %v327_v26 = vadd.f32 %v319_v20, %v255_v23 }
 0x1c7   :  { %vm333_vm9 = vcmp.gt.f32.partialorder %v327_v26, 0.0  ;;  %v339_v30 = vmul.f32 0.2, %v327_v26 }
 0x1c9   :  { %v345_v33 = vsel %vm333_vm9, %v327_v26, %v339_v30 }
 0x1ca   :  { %v352_v36 = vsel %vm150_vm1, %v345_v33, -inf }
 0x1cb   :  { %v353_v39 = vmax.f32 %v347_v35, %v352_v36 }
 0x1cd   :  { %v354_v42 = vmax.f32 %v351_v38, %v353_v39 }
 0x1cf   :  { %v356_v45 = vmax.f32 %v354_v42, %v355_v44 }
 0x1d1   :  { %357 = vmax.xlane.f32.xlu0 %v356_v45 }
 0x244   :  { %v358_v46 = vpop.xlane.xlu0 %357 }
 0x245   :  { %v359_v48 = vrot.slane %v358_v46, 4 }
 0x247   :  { %v360_v49 = vmax.f32 %v358_v46, %v359_v48 }
 0x249   :  { %v361_v55 = vrot.slane %v360_v49, 2 }
 0x24b   :  { %v362_v56 = vmax.f32 %v360_v49, %v361_v55 }
 0x24d   :  { %v363_v57 = vrot.slane %v362_v56, 1 }
 0x24f   :  { %v364_v58 = vmax.f32 %v362_v56, %v363_v57 }
 0x251   :  { %736 = vpush %v364_v58 }
 0x282   :  { %s737_s4 = spop %736 }
 0x283   :  { %v366_v59 = vstv %s737_s4 }
 0x284   :  { %v372_v60 = vsub.f32 %v345_v33, %v366_v59  ;;  %v371_v61 = vsub.f32 %v344_v25, %v366_v59  ;;  %v370_v62 = vsub.f32 %v343_v29, %v366_v59  ;;  %v369_v1 = vsub.f32 %v342_v32, %v366_v59 }
 0x285   :  { %v368_v3 = vsub.f32 %v341_v28, %v366_v59  ;;  %v367_v5 = vsub.f32 %v340_v27, %v366_v59 }
 0x286   :  { %v383_v63 = vmul.f32 1.442695, %v372_v60  ;;  %v381_v0 = vmul.f32 1.442695, %v371_v61  ;;  %v379_v2 = vmul.f32 1.442695, %v370_v62 }
 0x287   :  { %v377_v4 = vmul.f32 1.442695, %v369_v1  ;;  %v375_v6 = vmul.f32 1.442695, %v368_v3  ;;  %v373_v8 = vmul.f32 1.442695, %v367_v5 }
 0x288   :  { %745 = vpow2.f32 %v383_v63 }
 0x289   :  { %747 = vpow2.f32 %v381_v0 }
 0x28a   :  { %749 = vpow2.f32 %v379_v2 }
 0x28b   :  { %751 = vpow2.f32 %v377_v4 }
 0x28c   :  { %753 = vpow2.f32 %v375_v6 }
 0x28d   :  { %755 = vpow2.f32 %v373_v8 }
 0x28e   :  { %v1007_v7 = vpop.eup %745 }
 0x28f   :  { %402 = vmatpush.msrb.mxu2 %v1007_v7  ;;  %v1010_v9 = vpop.eup %747 }
 0x290   :  { %v1013_v10 = vpop.eup %749 }
 0x291   :  { %403 = vmatpush.msrb.mxu2 %v1010_v9  ;;  %v1016_v11 = vpop.eup %751 }
 0x292   :  { %v1019_v12 = vpop.eup %753 }
 0x293   :  { %404 = vmatpush.msrb.mxu2 %v1013_v10  ;;  %v756_v14 = vpop.eup %755 }
 0x295   :  { %405 = vmatpush.msrb.mxu2 %v1016_v11 }
 0x297   :  { %406 = vmatpush.msrb.mxu2 %v1019_v12 }
 0x299   :  { %407 = vmatpush.msrb.mxu2 %v756_v14 }
 0x29a   :  { %706 = vmatmul.msk.f32.vlgmr.msrb.gmra.mxu2 %vm385_vm10, %v1025_v13 }
 0x2a2   :  { %707 = vmatmul.msk.f32.gmra.mxu2 %vm385_vm10, %v1032_v15 }
 0x31d   :  { %v409_v16 = vpop.f32.mrf.mxu2 }
 0x325   :  { %v412_v17 = vpop.f32.mrf.mxu2 }
 0x326   :  { %429 = vmatpush.msra.mxu2 %v412_v17 }
 0x328   :  { %430 = vmatpush.msra.mxu2 %v409_v16 }
 0x329   :  { %708 = vmatmul.msk.f32.vlgmr.msra.gmra.mxu2 %vm150_vm1, %v932_v40  ;;  %v540_v40 = vld [vmem:[%s1082_s6] sm:$0xff] }
 0x32a   :  { %575 = vmatpush.msrb.mxu3 %v540_v40 }
 0x331   :  { %709 = vmatmul.msk.f32.gmra.mxu2 %vm150_vm1, %v947_v43 }
 0x339   :  { %710 = vmatmul.msk.f32.gmra.mxu2 %vm150_vm1, %v962_v47 }
 0x341   :  { %711 = vmatmul.msk.f32.gmra.mxu2 %vm150_vm1, %v974_v50 }
 0x349   :  { %712 = vmatmul.msk.f32.gmra.mxu2 %vm150_vm1, %v982_v51 }
 0x351   :  { %713 = vmatmul.msk.f32.gmra.mxu2 %vm150_vm1, %v990_v52 }
 0x3ac   :  { %v432_v43 = vpop.f32.mrf.mxu2 }
 0x3ad   :  { %v433_v47 = vadd.f32 1e-16, %v432_v43 }
 0x3af   :  { %757 = vrcp.f32 %v433_v47  ;;  %v461_v52 = vand.u32 2147483648, %v433_v47  ;;  %v459_v23 = vand.u32 2147483647, %v433_v47  ;;  %vm455_vm12 = vweird.f32 %v433_v47 }
 0x3b1   :  { %v462_v28 = vor.u32 1.1754944e-38, %v461_v52  ;;  %vm460_vm14 = vcmp.eq.f32.partialorder %v459_v23, 8.507059e+37 }
 0x3b4   :  { %v435_v50 = vpop.f32.mrf.mxu2 }
 0x3b5   :  { %v758_v19 = vpop.eup %757  ;;  %v436_v20 = vadd.f32 1e-16, %v435_v50 }
 0x3b6   :  { %v451_v51 = vmul.f32 %v758_v19, %v433_v47  ;;  %vm456_vm11 = vweird.f32 %v758_v19 }
 0x3b7   :  { %759 = vrcp.f32 %v436_v20  ;;  %vm457_vm13 = vmor %vm455_vm12, %vm456_vm11  ;;  %v476_v34 = vand.u32 2147483648, %v436_v20  ;;  %v474_v36 = vand.u32 2147483647, %v436_v20  ;;  %vm470_vm0 = vweird.f32 %v436_v20 }
 0x3b8   :  { %v452_v21 = vsub.f32 1.0, %v451_v51 }
 0x3b9   :  { %v477_v42 = vor.u32 1.1754944e-38, %v476_v34  ;;  %vm475_vm3 = vcmp.eq.f32.partialorder %v474_v36, 8.507059e+37  ;;  %v612_v34 = vpop.f32.mrf.mxu0 }
 0x3ba   :  { %v453_v22 = vmul.f32 %v758_v19, %v452_v21 }
 0x3bc   :  { %v438_v24 = vpop.f32.mrf.mxu2  ;;  %v454_v25 = vadd.f32 %v758_v19, %v453_v22 }
 0x3bd   :  { %v760_v26 = vpop.eup %759  ;;  %v439_v27 = vadd.f32 1e-16, %v438_v24 }
 0x3be   :  { %v466_v29 = vmul.f32 %v760_v26, %v436_v20  ;;  %v458_v30 = vsel %vm457_vm13, %v758_v19, %v454_v25  ;;  %vm471_vm15 = vweird.f32 %v760_v26 }
 0x3bf   :  { %761 = vrcp.f32 %v439_v27  ;;  %v463_v31 = vsel %vm460_vm14, %v462_v28, %v458_v30  ;;  %vm472_vm2 = vmor %vm470_vm0, %vm471_vm15  ;;  %v491_v55 = vand.u32 2147483648, %v439_v27  ;;  %v489_v57 = vand.u32 2147483647, %v439_v27 }
 0x3c0   :  { %v467_v32 = vsub.f32 1.0, %v466_v29  ;;  %v464_v33 = vmul.f32 %v756_v14, %v463_v31  ;;  %vm485_vm5 = vweird.f32 %v439_v27 }
 0x3c1   :  { %v492_v62 = vor.u32 1.1754944e-38, %v491_v55  ;;  %vm490_vm7 = vcmp.eq.f32.partialorder %v489_v57, 8.507059e+37 }
 0x3c2   :  { %714 = vmatmul.msk.f32.vlgmr.msrb.gmra.mxu3 %vm150_vm1, %v464_v33  ;;  %v468_v35 = vmul.f32 %v760_v26, %v467_v32 }
 0x3c4   :  { %v441_v37 = vpop.f32.mrf.mxu2  ;;  %v469_v38 = vadd.f32 %v760_v26, %v468_v35  ;;  %v615_v35 = vpop.f32.mrf.mxu0 }
 0x3c5   :  { %v762_v39 = vpop.eup %761  ;;  %v442_v41 = vadd.f32 1e-16, %v441_v37 }
 0x3c6   :  { %v481_v44 = vmul.f32 %v762_v39, %v439_v27  ;;  %v473_v45 = vsel %vm472_vm2, %v760_v26, %v469_v38  ;;  %vm486_vm4 = vweird.f32 %v762_v39 }
 0x3c7   :  { %763 = vrcp.f32 %v442_v41  ;;  %v478_v46 = vsel %vm475_vm3, %v477_v42, %v473_v45  ;;  %vm487_vm6 = vmor %vm485_vm5, %vm486_vm4  ;;  %v506_v4 = vand.u32 2147483648, %v442_v41  ;;  %v504_v6 = vand.u32 2147483647, %v442_v41 }
 0x3c8   :  { %v482_v48 = vsub.f32 1.0, %v481_v44  ;;  %v479_v49 = vmul.f32 %v1019_v12, %v478_v46  ;;  %vm500_vm9 = vweird.f32 %v442_v41 }
 0x3c9   :  { %v507_v17 = vor.u32 1.1754944e-38, %v506_v4  ;;  %vm505_vm12 = vcmp.eq.f32.partialorder %v504_v6, 8.507059e+37 }
 0x3ca   :  { %715 = vmatmul.msk.f32.gmra.mxu3 %vm150_vm1, %v479_v49  ;;  %v483_v56 = vmul.f32 %v762_v39, %v482_v48 }
 0x3cc   :  { %v444_v58 = vpop.f32.mrf.mxu2  ;;  %v484_v59 = vadd.f32 %v762_v39, %v483_v56  ;;  %v618_v37 = vpop.f32.mrf.mxu0 }
 0x3cd   :  { %v764_v60 = vpop.eup %763  ;;  %v445_v61 = vadd.f32 1e-16, %v444_v58  ;;  %v744_v58 = vld [vmem:[%s1082_s6 + $0x10] ss:$0 sm:$0xff] }
 0x3ce   :  { %v496_v63 = vmul.f32 %v764_v60, %v442_v41  ;;  %v488_v0 = vsel %vm487_vm6, %v762_v39, %v484_v59  ;;  %vm501_vm8 = vweird.f32 %v764_v60 }
 0x3cf   :  { %765 = vrcp.f32 %v445_v61  ;;  %v493_v1 = vsel %vm490_vm7, %v492_v62, %v488_v0  ;;  %vm502_vm11 = vmor %vm500_vm9, %vm501_vm8  ;;  %v521_v50 = vand.u32 2147483648, %v445_v61  ;;  %v519_v20 = vand.u32 2147483647, %v445_v61 }
 0x3d0   :  { %v497_v2 = vsub.f32 1.0, %v496_v63  ;;  %v494_v3 = vmul.f32 %v1016_v11, %v493_v1  ;;  %vm515_vm14 = vweird.f32 %v445_v61 }
 0x3d1   :  { %v522_v52 = vor.u32 1.1754944e-38, %v521_v50  ;;  %vm520_vm0 = vcmp.eq.f32.partialorder %v519_v20, 8.507059e+37 }
 0x3d2   :  { %716 = vmatmul.msk.f32.gmra.mxu3 %vm150_vm1, %v494_v3  ;;  %v498_v5 = vmul.f32 %v764_v60, %v497_v2 }
 0x3d4   :  { %v447_v8 = vpop.f32.mrf.mxu2  ;;  %v499_v12 = vadd.f32 %v764_v60, %v498_v5  ;;  %v621_v39 = vpop.f32.mrf.mxu0 }
 0x3d5   :  { %v766_v14 = vpop.eup %765  ;;  %v448_v16 = vadd.f32 1e-16, %v447_v8 }
 0x3d6   :  { %v511_v18 = vmul.f32 %v766_v14, %v445_v61  ;;  %v503_v40 = vsel %vm502_vm11, %v764_v60, %v499_v12  ;;  %vm516_vm13 = vweird.f32 %v766_v14 }
 0x3d7   :  { %767 = vrcp.f32 %v448_v16  ;;  %v508_v43 = vsel %vm505_vm12, %v507_v17, %v503_v40  ;;  %vm517_vm15 = vmor %vm515_vm14, %vm516_vm13  ;;  %v536_v27 = vand.u32 2147483648, %v448_v16  ;;  %v534_v28 = vand.u32 2147483647, %v448_v16 }
 0x3d8   :  { %v512_v47 = vsub.f32 1.0, %v511_v18  ;;  %v509_v11 = vmul.f32 %v1013_v10, %v508_v43  ;;  %vm530_vm3 = vweird.f32 %v448_v16 }
 0x3d9   :  { %v537_v30 = vor.u32 1.1754944e-38, %v536_v27  ;;  %vm535_vm5 = vcmp.eq.f32.partialorder %v534_v28, 8.507059e+37 }
 0x3da   :  { %717 = vmatmul.msk.f32.gmra.mxu3 %vm150_vm1, %v509_v11  ;;  %v513_v19 = vmul.f32 %v766_v14, %v512_v47 }
 0x3dc   :  { %v514_v51 = vadd.f32 %v766_v14, %v513_v19  ;;  %v624_v42 = vpop.f32.mrf.mxu0 }
 0x3dd   :  { %v768_v21 = vpop.eup %767 }
 0x3de   :  { %v526_v22 = vmul.f32 %v768_v21, %v448_v16  ;;  %v518_v23 = vsel %vm517_vm15, %v766_v14, %v514_v51  ;;  %vm531_vm2 = vweird.f32 %v768_v21 }
 0x3df   :  { %v523_v24 = vsel %vm520_vm0, %v522_v52, %v518_v23  ;;  %vm532_vm4 = vmor %vm530_vm3, %vm531_vm2 }
 0x3e0   :  { %v527_v25 = vsub.f32 1.0, %v526_v22  ;;  %v524_v26 = vmul.f32 %v1010_v9, %v523_v24 }
 0x3e2   :  { %718 = vmatmul.msk.f32.gmra.mxu3 %vm150_vm1, %v524_v26  ;;  %v528_v10 = vmul.f32 %v768_v21, %v527_v25 }
 0x3e4   :  { %v529_v29 = vadd.f32 %v768_v21, %v528_v10  ;;  %v627_v45 = vpop.f32.mrf.mxu0 }
 0x3e6   :  { %v533_v31 = vsel %vm532_vm4, %v768_v21, %v529_v29 }
 0x3e7   :  { %v538_v32 = vsel %vm535_vm5, %v537_v30, %v533_v31 }
 0x3e8   :  { %v539_v33 = vmul.f32 %v1007_v7, %v538_v32 }
 0x3ea   :  { %719 = vmatmul.msk.f32.gmra.mxu3 %vm150_vm1, %v539_v33 }
 0x445   :  { %v577_v9 = vpop.f32.mrf.mxu3 }
 0x446   :  { %v630_v57 = vmul.f32 %v612_v34, %v577_v9 }
 0x44d   :  { %v580_v36 = vpop.f32.mrf.mxu3 }
 0x44e   :  { %v631_v56 = vmul.f32 %v615_v35, %v580_v36 }
 0x455   :  { %v583_v38 = vpop.f32.mrf.mxu3 }
 0x456   :  { %v632_v7 = vmul.f32 %v618_v37, %v583_v38 }
 0x45d   :  { %v586_v41 = vpop.f32.mrf.mxu3 }
 0x45e   :  { %v633_v55 = vmul.f32 %v621_v39, %v586_v41 }
 0x465   :  { %v589_v44 = vpop.f32.mrf.mxu3 }
 0x466   :  { %v634_v49 = vmul.f32 %v624_v42, %v589_v44 }
 0x46d   :  { %v592_v46 = vpop.f32.mrf.mxu3 }
 0x46e   :  { %v635_v48 = vmul.f32 %v627_v45, %v592_v46 }
 0x470   :  { %647 = vmatpush.msrb.mxu1 %v635_v48  ;;  %730 = vmatpush.msrb.mxu2 %v635_v48 }
 0x472   :  { %648 = vmatpush.msrb.mxu1 %v634_v49  ;;  %731 = vmatpush.msrb.mxu2 %v634_v49 }
 0x474   :  { %649 = vmatpush.msrb.mxu1 %v633_v55  ;;  %732 = vmatpush.msrb.mxu2 %v633_v55 }
 0x476   :  { %650 = vmatpush.msrb.mxu1 %v632_v7  ;;  %733 = vmatpush.msrb.mxu2 %v632_v7 }
 0x478   :  { %651 = vmatpush.msrb.mxu1 %v631_v56  ;;  %734 = vmatpush.msrb.mxu2 %v631_v56 }
 0x47a   :  { %652 = vmatpush.msrb.mxu1 %v630_v57  ;;  %735 = vmatpush.msrb.mxu2 %v630_v57 }
 0x47b   :  { %726 = vmatmul.msk.f32.vlgmr.msrb.gmra.mxu1 %vm385_vm10, %v1025_v13  ;;  %727 = vmatmul.msk.f32.vlgmr.msrb.gmra.mxu2 %vm385_vm10, %v1032_v15 }
 0x4f8   :  { %v654_v59 = vpop.f32.mrf.mxu1 }
 0x4f9   :  { %v655_v60 = vadd.f32 %v654_v59, %v997_v53 }
 0x4fb   :  { %v661_v61 = vadd.f32 %v744_v58, %v655_v60 }
 0x4fd   :  { %v665_v62 = vmin.f32 %v661_v61, 0.0  ;;  %vm663_vm1 = vcmp.gt.f32.partialorder %v661_v61, 0.0 }
 0x4fe   :  { %v657_v63 = vpop.f32.mrf.mxu2 }
 0x4ff   :  { %v667_v0 = vmul.f32 1.442695, %v665_v62  ;;  %v658_v1 = vadd.f32 %v657_v63, %v999_v54 }
 0x501   :  { %769 = vpow2.f32 %v667_v0  ;;  %v662_v2 = vadd.f32 %v744_v58, %v658_v1 }
 0x503   :  { %v666_v3 = vmin.f32 %v662_v2, 0.0  ;;  %vm664_vm10 = vcmp.gt.f32.partialorder %v662_v2, 0.0 }
 0x505   :  { %v669_v13 = vmul.f32 1.442695, %v666_v3 }
 0x507   :  { %v770_v4 = vpop.eup %769  ;;  %771 = vpow2.f32 %v669_v13 }
 0x508   :  { %v728_v15 = vadd.f32 -1.0, %v770_v4 }
 0x50a   :  { %v673_v5 = vsel %vm663_vm1, %v661_v61, %v728_v15 }
 0x50b   :  { %675 = vst [vmem:[%s1087_s7] sm:$0xff] %v673_v5 }
 0x50d   :  { %v772_v53 = vpop.eup %771 }
 0x50e   :  { %v729_v6 = vadd.f32 -1.0, %v772_v53 }
 0x510   :  { %v674_v8 = vsel %vm664_vm10, %v662_v2, %v729_v6 }
 0x511   :  { %676 = vst [vmem:[%s1087_s7 + $0x8] sm:$0xff] %v674_v8 }

</bundles_post_ra>
